<compile_context>
chip_gen: v7x
topology: tpu7x:2x2x1
jax: 0.10.0
libtpu: 0.0.40
codegen_flags: <defaults>
</compile_context>

<pallas_src>
import functools

import jax
import jax.numpy as jnp
from jax.experimental import pallas as pl
from jax.experimental.pallas import tpu as pltpu

SUBLANE = 8  # TPU vreg sublane width

# Single explicit precision used by BOTH the kernel and the reference so the
# two paths are numerically identical by construction.
MATMUL_PRECISION = jax.lax.Precision.DEFAULT


def mlp_kernel(x_ref, w1_ref, b1_ref, w2_ref, b2_ref, o_ref):
    # Fused: matmul (MXU) -> bias+ReLU (VPU, f32) -> matmul (MXU) -> bias ->
    # single cast at the store.
    x = x_ref[...]
    h = jnp.dot(x, w1_ref[...],
                preferred_element_type=jnp.float32,
                precision=MATMUL_PRECISION) + b1_ref[...]
    h = jnp.maximum(h, 0.0)
    y = jnp.dot(h, w2_ref[...],
                preferred_element_type=jnp.float32,
                precision=MATMUL_PRECISION) + b2_ref[...]
    o_ref[...] = y.astype(o_ref.dtype)


@functools.partial(jax.jit, static_argnames=("tb",))
def toy_dpp_forward(x, w1, b1, w2, b2, *, tb=2048):
    """Pallas implementation of ToyDPP(module).forward(x) for the MLP module."""
    B, Din = x.shape
    Dh = w1.shape[1]
    Dout = w2.shape[1]

    b1 = b1.reshape(1, Dh)
    b2 = b2.reshape(1, Dout)

    # Batch tile: multiple of the sublane width, as large as `tb`, but capped
    # so the grid keeps at least 2 steps when B allows it (keeps both v7x
    # TensorCores busy via the "parallel" axis).
    TB = min(tb, pl.cdiv(B, 2))
    TB = max(SUBLANE, pl.cdiv(TB, SUBLANE) * SUBLANE)
    grid = (pl.cdiv(B, TB),)  # ragged last block is clipped on writeback

    out = pl.pallas_call(
        mlp_kernel,
        out_shape=jax.ShapeDtypeStruct((B, Dout), x.dtype),
        grid=grid,
        in_specs=[
            # Activations stream one batch tile per grid step; last dim equals
            # the full array dim (no lane padding, minimal HBM traffic).
            pl.BlockSpec((TB, Din), lambda i: (i, 0)),
            # Weights / biases: constant index_map -> resident in VMEM.
            pl.BlockSpec((Din, Dh), lambda i: (0, 0)),
            pl.BlockSpec((1, Dh), lambda i: (0, 0)),
            pl.BlockSpec((Dh, Dout), lambda i: (0, 0)),
            pl.BlockSpec((1, Dout), lambda i: (0, 0)),
        ],
        out_specs=pl.BlockSpec((TB, Dout), lambda i: (i, 0)),
        compiler_params=pltpu.CompilerParams(
            dimension_semantics=("parallel",)),  # shard batch across TCs (v7x)
    )(x, w1, b1, w2, b2)

    return out


def reference_forward(x, w1, b1, w2, b2):
    # Same explicit precision as the kernel.
    h = jnp.maximum(
        jnp.dot(x, w1, precision=MATMUL_PRECISION) + b1.reshape(1, -1), 0.0)
    return jnp.dot(h, w2, precision=MATMUL_PRECISION) + b2.reshape(1, -1)


if __name__ == "__main__":
    # ToyDPP itself adds no parameters; the wrapped module's params are
    # initialized deterministically here (synthetic init, no checkpoint).
    # TODO(synk): dist.broadcast / all_reduce gradient bucketing from ToyDPP's
    # reducers is training-time collective logic, not forward-pass compute.
    key = jax.random.PRNGKey(0)
    kx, kxl, kxr, k1, kb1, k2, kb2 = jax.random.split(key, 7)

    Din, Dh, Dout = 32, 64, 32
    bound1 = 1.0 / (Din ** 0.5)
    bound2 = 1.0 / (Dh ** 0.5)
    w1 = jax.random.uniform(k1, (Din, Dh), jnp.float32, -bound1, bound1)
    b1 = jax.random.uniform(kb1, (1, Dh), jnp.float32, -bound1, bound1)
    w2 = jax.random.uniform(k2, (Dh, Dout), jnp.float32, -bound2, bound2)
    b2 = jax.random.uniform(kb2, (1, Dout), jnp.float32, -bound2, bound2)

    # Case 1: toy batch (matches the original ToyDPP toy scale).
    B_small = 8
    x_small = jax.random.normal(kx, (B_small, Din), dtype=jnp.float32)
    out_small = jax.block_until_ready(toy_dpp_forward(x_small, w1, b1, w2, b2))
    ref_small = reference_forward(x_small, w1, b1, w2, b2)
    assert out_small.shape == (B_small, Dout)
    assert jnp.allclose(out_small, ref_small, atol=1e-5, rtol=1e-5), \
        "mismatch vs reference (small batch)"

    # Case 2: larger batch — exercises the batch grid (grid=(2,), TB=512) and
    # the parallel axis with lane-unpadded streaming I/O.
    B_big = 1024
    x_big = jax.random.normal(kxl, (B_big, Din), dtype=jnp.float32)
    out_big = jax.block_until_ready(toy_dpp_forward(x_big, w1, b1, w2, b2))
    ref_big = reference_forward(x_big, w1, b1, w2, b2)
    assert out_big.shape == (B_big, Dout)
    assert jnp.allclose(out_big, ref_big, atol=1e-5, rtol=1e-5), \
        "mismatch vs reference (batched)"

    # Case 3: ragged batch (B not a multiple of the tile) — verifies the
    # clipped-writeback path with no wrapper-side batch padding.
    B_ragged = 20
    x_ragged = jax.random.normal(kxr, (B_ragged, Din), dtype=jnp.float32)
    out_ragged = jax.block_until_ready(
        toy_dpp_forward(x_ragged, w1, b1, w2, b2))
    ref_ragged = reference_forward(x_ragged, w1, b1, w2, b2)
    assert out_ragged.shape == (B_ragged, Dout)
    assert jnp.allclose(out_ragged, ref_ragged, atol=1e-5, rtol=1e-5), \
        "mismatch vs reference (ragged batch)"

    print("KERNEL_OK")
</pallas_src>

<mosaic_0001>
module attributes {stable_mosaic.version = 11 : i64} {
  func.func @mlp_kernel(%arg0: i32, %arg1: memref<8x32xf32, #tpu.memory_space<vmem>>, %arg2: memref<32x64xf32, #tpu.memory_space<vmem>>, %arg3: memref<1x64xf32, #tpu.memory_space<vmem>>, %arg4: memref<64x32xf32, #tpu.memory_space<vmem>>, %arg5: memref<1x32xf32, #tpu.memory_space<vmem>>, %arg6: memref<8x32xf32, #tpu.memory_space<vmem>>) attributes {dimension_semantics = [#tpu.dimension_semantics<parallel>], iteration_bounds = array<i64: 1>, scalar_prefetch = 0 : i64, scratch_operands = 0 : i64, tpu.core_type = #tpu.core_type<tc>, window_params = [{transform_indices = @transform_0, window_bounds = array<i64: 8, 32>}, {pipeline_mode = #tpu.pipeline_mode<synchronous>, transform_indices = @transform_1, window_bounds = array<i64: 32, 64>}, {pipeline_mode = #tpu.pipeline_mode<synchronous>, transform_indices = @transform_2, window_bounds = array<i64: 1, 64>}, {pipeline_mode = #tpu.pipeline_mode<synchronous>, transform_indices = @transform_3, window_bounds = array<i64: 64, 32>}, {pipeline_mode = #tpu.pipeline_mode<synchronous>, transform_indices = @transform_4, window_bounds = array<i64: 1, 32>}, {transform_indices = @transform_5, window_bounds = array<i64: 8, 32>}]} {
    %c0 = arith.constant 0 : index
    %c0_0 = arith.constant 0 : index
    %0 = vector.load %arg1[%c0, %c0_0] : memref<8x32xf32, #tpu.memory_space<vmem>>, vector<8x32xf32>
    %c0_1 = arith.constant 0 : index
    %c0_2 = arith.constant 0 : index
    %1 = vector.load %arg2[%c0_1, %c0_2] : memref<32x64xf32, #tpu.memory_space<vmem>>, vector<32x64xf32>
    %cst = arith.constant dense<0.000000e+00> : vector<8x64xf32>
    %2 = tpu.matmul %0, %1, %cst {dimension_numbers = #tpu.dot_dimension_numbers<[1], [0], [0], [1], [0, 0, 1, 1], [], []>} : vector<8x32xf32>, vector<32x64xf32>, vector<8x64xf32> -> vector<8x64xf32>
    %c0_3 = arith.constant 0 : index
    %c0_4 = arith.constant 0 : index
    %3 = vector.load %arg3[%c0_3, %c0_4] : memref<1x64xf32, #tpu.memory_space<vmem>>, vector<1x64xf32>
    %4 = vector.broadcast %3 : vector<1x64xf32> to vector<8x64xf32>
    %5 = arith.addf %2, %4 : vector<8x64xf32>
    %cst_5 = arith.constant 0.000000e+00 : f32
    %6 = vector.broadcast %cst_5 : f32 to vector<8x64xf32>
    %7 = arith.maximumf %5, %6 : vector<8x64xf32>
    %c0_6 = arith.constant 0 : index
    %c0_7 = arith.constant 0 : index
    %8 = vector.load %arg4[%c0_6, %c0_7] : memref<64x32xf32, #tpu.memory_space<vmem>>, vector<64x32xf32>
    %cst_8 = arith.constant dense<0.000000e+00> : vector<8x32xf32>
    %9 = tpu.matmul %7, %8, %cst_8 {dimension_numbers = #tpu.dot_dimension_numbers<[1], [0], [0], [1], [0, 0, 1, 1], [], []>} : vector<8x64xf32>, vector<64x32xf32>, vector<8x32xf32> -> vector<8x32xf32>
    %c0_9 = arith.constant 0 : index
    %c0_10 = arith.constant 0 : index
    %10 = vector.load %arg5[%c0_9, %c0_10] : memref<1x32xf32, #tpu.memory_space<vmem>>, vector<1x32xf32>
    %11 = vector.broadcast %10 : vector<1x32xf32> to vector<8x32xf32>
    %12 = arith.addf %9, %11 : vector<8x32xf32>
    %c0_11 = arith.constant 0 : index
    %c0_12 = arith.constant 0 : index
    %13 = vector.load %arg6[%c0_11, %c0_12] : memref<8x32xf32, #tpu.memory_space<vmem>>, vector<8x32xf32>
    tpu.vector_store %arg6[%c0_11, %c0_12], %12 {strides = array<i32>} : memref<8x32xf32, #tpu.memory_space<vmem>>, vector<8x32xf32>,
    return
  }
  func.func @transform_0(%arg0: i32) -> (i32, i32) {
    %c0_i32 = arith.constant 0 : i32
    %c0_i32_0 = arith.constant 0 : i32
    return %arg0, %c0_i32 : i32, i32
  }
  func.func @transform_1(%arg0: i32) -> (i32, i32) {
    %c0_i32 = arith.constant 0 : i32
    %c0_i32_0 = arith.constant 0 : i32
    %c0_i32_1 = arith.constant 0 : i32
    return %c0_i32, %c0_i32_0 : i32, i32
  }
  func.func @transform_2(%arg0: i32) -> (i32, i32) {
    %c0_i32 = arith.constant 0 : i32
    %c0_i32_0 = arith.constant 0 : i32
    %c0_i32_1 = arith.constant 0 : i32
    return %c0_i32, %c0_i32_0 : i32, i32
  }
  func.func @transform_3(%arg0: i32) -> (i32, i32) {
    %c0_i32 = arith.constant 0 : i32
    %c0_i32_0 = arith.constant 0 : i32
    %c0_i32_1 = arith.constant 0 : i32
    return %c0_i32, %c0_i32_0 : i32, i32
  }
  func.func @transform_4(%arg0: i32) -> (i32, i32) {
    %c0_i32 = arith.constant 0 : i32
    %c0_i32_0 = arith.constant 0 : i32
    %c0_i32_1 = arith.constant 0 : i32
    return %c0_i32, %c0_i32_0 : i32, i32
  }
  func.func @transform_5(%arg0: i32) -> (i32, i32) {
    %c0_i32 = arith.constant 0 : i32
    %c0_i32_0 = arith.constant 0 : i32
    return %arg0, %c0_i32 : i32, i32
  }
}

</mosaic_0001>

<bundles_post_ra>
// kernel: toy_dpp_forward.1
= control target key start
LH: loop header
LB: loop body
LE: loop exit
PB: predicated region body
PF: predicated region fallthrough
CT: control target
= control target key end

     0   :  { %v306_v3 = vmov 0.0|0.0   ;;  %vm307_vm0 = vmmov 0   ;;  %v308_v6 = vmov 0.0   ;;  %s399_s0 = inlined_call_operand.vmem [shape: f32[8,32], index: 0, kind: input, shape index: {}]   ;;  %s400_s1 = inlined_call_operand.vmem [shape: f32[32,64], index: 1, kind: input, shape index: {}]   ;;  %s401_s2 = inlined_call_operand.vmem [shape: f32[1,64], index: 2, kind: input, shape index: {}]   ;;  %s402_s3 = inlined_call_operand.vmem [shape: f32[64,32], index: 3, kind: input, shape index: {}]   ;;  %s403_s4 = inlined_call_operand.vmem [shape: f32[1,32], index: 4, kind: input, shape index: {}]   ;;  %s404_s5 = inlined_call_operand.hbm [shape: f32[8,32], index: 5, kind: output, shape index: {}]  }
   0x1   :  { %v22_v0 = vld [vmem:[%s400_s1] sm:$0xff]  ;;  %v23_v1 = vld [vmem:[%s400_s1 + $0x8] sm:$0xff]  ;;  %v24_v2 = vld [vmem:[%s400_s1 + $0x10] sm:$0xff]  ;;  %260 = vmatprep.subr.bf16.mxu0 %v306_v3  ;;  %238 = vmatprep.mubr.msk.f32.mxu0 %vm307_vm0, %v308_v6 }
   0x2   :  { %v261_v4 = vpack.c.bf16 %v23_v1, %v22_v0  ;;  %v25_v5 = vld [vmem:[%s400_s1 + $0x18] sm:$0xff]  ;;  %v108_v7 = vld [vmem:[%s402_s3] sm:$0xff]  ;;  %266 = vmatprep.subr.bf16.mxu1 %v306_v3  ;;  %v109_v8 = vld [vmem:[%s402_s3 + $0x8] sm:$0xff]  ;;  %257 = vmatprep.mubr.msk.f32.mxu1 %vm307_vm0, %v308_v6 }
   0x3   :  { %v110_v9 = vld [vmem:[%s402_s3 + $0x10] sm:$0xff]  ;;  %v111_v10 = vld [vmem:[%s402_s3 + $0x18] sm:$0xff]  ;;  %v264_v11 = vpack.c.bf16 %v25_v5, %v24_v2  ;;  %v267_v12 = vpack.c.bf16 %v109_v8, %v108_v7 }
   0x4   :  { %262 = vmatpush3.bf16.msra.mxu0 %v261_v4 }
   0x5   :  { %263 = vmatprep.subr.bf16.mxu0 %v306_v3 }
   0x6   :  { %10 = vsyncpa [#allocation3], 0  ;;  %268 = vmatpush3.bf16.msra.mxu1 %v267_v12  ;;  %v270_v13 = vpack.c.bf16 %v111_v10, %v110_v9  ;;  %v112_v14 = vld [vmem:[%s402_s3 + $0x20] sm:$0xff]  ;;  %v113_v15 = vld [vmem:[%s402_s3 + $0x28] sm:$0xff]  ;;  %vm33_vm1 = vcmask 261120   ;;  %vm123_vm2 = vcmask 523264  }
   0x7   :  { %269 = vmatprep.subr.bf16.mxu1 %v306_v3  ;;  %v21_v16 = vld [vmem:[%s399_s0] sm:$0xff]  ;;  %v273_v17 = vpack.c.bf16 %v113_v15, %v112_v14  ;;  %v114_v18 = vld [vmem:[%s402_s3 + $0x30] sm:$0xff]  ;;  %v115_v19 = vld [vmem:[%s402_s3 + $0x38] sm:$0xff]  ;;  %s309_s21 = smov [#allocation2]  }
   0x8   :  { %265 = vmatpush3.bf16.msra.mxu0 %v264_v11  ;;  %v276_v20 = vpack.c.bf16 %v115_v19, %v114_v18  ;;  %v212_v21 = vld [vmem:[%s401_s2] ss:$0 sm:$0xff]  ;;  %s204_s22 = sshll.u32 %s309_s21, 4  ;;  %s205_s22 = int_to_ptr.vmem [resolvable:$true] %s204_s22 }
   0x9   :  { %v214_v26 = vld [vmem:[%s403_s4] ss:$0 sm:$0xff]  ;;  %s282_s3 = scalar_lea.vmem %s205_s22, 128  ;;  %p287_p1 = scmp.lt.s32.totalorder %s205_s22, %s205_s22 }
   0xa   :  { %271 = vmatpush3.bf16.msra.mxu1 %v270_v13  ;;  %p283_p0 = scmp.ne.s32.totalorder %s205_s22, %s282_s3  ;;  %p288_p2 = scmp.lt.s32.totalorder %s282_s3, %s282_s3 }
   0xb   :  { %239 = vmatmul.mubr.msk.f32.vlgmr.msra.gmra.mrb[0].mxu0 %vm33_vm1, %v21_v16  ;;  %272 = vmatprep.subr.bf16.mxu1 %v306_v3 }
   0xc   :  { %p289_p3 = por %p288_p2, %p287_p1 }
   0xe   :  { %274 = vmatpush3.bf16.msra.mxu1 %v273_v17  ;;  %p290_p4 = pnand %p289_p3, %p283_p0 }
   0xf   :  { %275 = vmatprep.subr.bf16.mxu1 %v306_v3 }
  0x12   :  { %277 = vmatpush3.bf16.msra.mxu1 %v276_v20 }
  0xde   :  { %v103_v22 = vpop.f32.mrb[0].mxu0 }
  0xdf   :  { %v104_v23 = vadd.f32 %v212_v21, %v103_v22  ;;  %v240_v24 = vpop.f32.mrb[1].mxu0 }
  0xe1   :  { %v107_v25 = vmax.f32 %v104_v23, 0.0 }
  0xe3   :  { %258 = vmatmul.mubr.msk.f32.vlgmr.msra.gmra.mrb[0].mxu1 %vm123_vm2, %v107_v25 }
 0x1b6   :  { %v193_v27 = vpop.f32.mrb[0].mxu1 }
 0x1b7   :  { %v194_v28 = vadd.f32 %v214_v26, %v193_v27  ;;  %v259_v29 = vpop.f32.mrb[1].mxu1 }
 0x1b9   :  { %197 = vst.msk [vmem:[#allocation2] sm:$0xff] %vm33_vm1, %v194_v28 }
 0x1ba   :  { %293 = shalt.err (!%p290_p4)
}
 0x1bb   :  { %s294_s24 = scalar_lea.hbm %s404_s5, 128 }
 0x1bc   :  { %p295_p5 = scmp.ne.s32.totalorder %s404_s5, %s294_s24  ;;  %p298_p6 = scmp.lt.u32.totalorder %s294_s24, %s404_s5 }
 0x1be   :  { %p300_p7 = pnand %p298_p6, %p295_p5 }
 0x1c0   :  { %303 = shalt.err (!%p300_p7)
}
 0x1c1   :  { %207 = dma.vmem_to_hbm [thread:$0]  %s205_s22, 128, %s404_s5, [#allocation3]  }
 0x1c2   :  { %304 = dma.done.wait [#allocation3], 128  }
 0x1c3   :  { %305 = vsyncadd [#allocation3], 4294967168 }
 0x1c4   :  { %211 = vsyncpa [#allocation3], 1 }

</bundles_post_ra>
